<compile_context>
chip_gen: v7x
topology: tpu7x:2x2x1
jax: 0.10.0
libtpu: 0.0.40
codegen_flags: <defaults>
</compile_context>

<pallas_src>
import functools

import jax
import jax.numpy as jnp
from jax.experimental import pallas as pl
from jax.experimental.pallas import tpu as pltpu


def _llama_hidden_dim(dim: int, hidden_dim: int, multiple_of: int,
                      ffn_dim_multiplier=None) -> int:
    hidden_dim = int(2 * hidden_dim / 3)
    if ffn_dim_multiplier is not None:
        hidden_dim = int(ffn_dim_multiplier * hidden_dim)
    hidden_dim = multiple_of * ((hidden_dim + multiple_of - 1) // multiple_of)
    return hidden_dim


def _round_up(a: int, b: int) -> int:
    return ((a + b - 1) // b) * b


def _largest_divisor_leq(n: int, cap: int) -> int:
    cap = max(1, min(cap, n))
    for d in range(cap, 0, -1):
        if n % d == 0:
            return d
    return n


@functools.lru_cache(maxsize=1)
def _tpu_defaults():
    """Per-generation (tm, th, vmem_capacity_bytes) derived from the roofline."""
    vmem_cap = None
    try:
        vmem_cap = int(pltpu.get_tpu_info().vmem_capacity_bytes)
    except Exception:
        vmem_cap = None
    kind = ""
    try:
        kind = jax.devices()[0].device_kind.lower()
    except Exception:
        kind = ""
    if "v7" in kind:
        # ridge ~ 996 TF/s / 3.2 TB/s ~ 310 flops/byte; 64 MiB VMEM per TC.
        return 512, 512, vmem_cap or (64 << 20)
    if "v6" in kind:
        # ridge ~ 918 TF/s / 1.4 TB/s ~ 650 flops/byte; 128 MiB VMEM.
        return 1024, 512, vmem_cap or (128 << 20)
    if "v5" in kind:
        # ridge ~ 197 TF/s / 0.82 TB/s ~ 240 flops/byte; spend VMEM on th.
        return 256, 2048, vmem_cap or (128 << 20)
    # Unknown chip: conservative (v7x-safe) defaults.
    return 512, 512, vmem_cap or (64 << 20)


# ----------------------------------------------------------------------------
# One-time weight preparation (parameter-init time, NOT per forward call).
# ----------------------------------------------------------------------------
def prepare_ffn_weights(w1, w2, w3, *, th=None, compute_dtype=jnp.bfloat16,
                        allow_single_chunk=True, single_chunk_vmem_frac=0.25):
    """Prepare PyTorch-layout weights for the kernel.

    w1, w3: (hidden, dim)  nn.Linear layout (out, in);  w2: (dim, hidden)

    Returns:
      w13: (n_chunks, dim, 2*th)  per-chunk [W1^T_chunk | W3^T_chunk]
      w2c: (n_chunks, th, dim)    per-chunk W2^T
    """
    hidden, dim = w1.shape
    assert w2.shape == (dim, hidden) and w3.shape == (hidden, dim)

    _, th_def, vmem_cap = _tpu_defaults()
    th_target = th if th is not None else max(256, th_def)

    w_item = jnp.dtype(compute_dtype).itemsize
    total_w_bytes = 3 * dim * hidden * w_item
    if allow_single_chunk and total_w_bytes <= single_chunk_vmem_frac * vmem_cap:
        # Weights fit comfortably in VMEM: single chunk -> fused 1-D-grid path.
        th_eff = hidden
    else:
        # Largest divisor of hidden that respects the requested chunk size
        # (keeps the down-projection contraction deep; never th=hidden blowup).
        th_eff = _largest_divisor_leq(hidden, th_target)
    n = hidden // th_eff

    w1t = w1.T.astype(compute_dtype)   # (dim, hidden)
    w3t = w3.T.astype(compute_dtype)   # (dim, hidden)
    w2t = w2.T.astype(compute_dtype)   # (hidden, dim)

    w1c = w1t.reshape(dim, n, th_eff).transpose(1, 0, 2)   # (n, dim, th)
    w3c = w3t.reshape(dim, n, th_eff).transpose(1, 0, 2)   # (n, dim, th)
    w13 = jnp.concatenate([w1c, w3c], axis=-1)             # (n, dim, 2*th)
    w2c = w2t.reshape(n, th_eff, dim)                      # (n, th, dim)
    return w13, w2c


# ----------------------------------------------------------------------------
# Kernels
# ----------------------------------------------------------------------------
def _ffn_kernel_fused(x_ref, w13_ref, w2_ref, o_ref):
    # Single hidden chunk: weights fully VMEM-resident, 1-D token grid.
    hidden = w2_ref.shape[0]
    x = x_ref[...].astype(w13_ref.dtype)
    h13 = jnp.dot(x, w13_ref[...], preferred_element_type=jnp.float32)
    h1 = h13[:, :hidden]
    h3 = h13[:, hidden:]
    gated = (h1 * jax.nn.sigmoid(h1)) * h3                 # SiLU gate in f32
    o_ref[...] = jnp.dot(gated.astype(w2_ref.dtype), w2_ref[...],
                         preferred_element_type=jnp.float32).astype(o_ref.dtype)


def _ffn_kernel_chunked(x_ref, w13_ref, w2_ref, o_ref, acc_ref):
    # x_ref:   (tm, dim)       token tile (cast to compute dtype in-kernel)
    # w13_ref: (dim, 2*th)     fused [W1^T | W3^T] hidden chunk
    # w2_ref:  (th, dim)       W2^T hidden chunk
    # o_ref:   (tm, dim)       output tile (written on last hidden step)
    # acc_ref: (tm, dim) f32   VMEM accumulator (resident across hidden axis)
    h_idx = pl.program_id(1)
    n_h = pl.num_programs(1)
    th = w2_ref.shape[0]

    x = x_ref[...].astype(w13_ref.dtype)
    h13 = jnp.dot(x, w13_ref[...], preferred_element_type=jnp.float32)
    h1 = h13[:, :th]
    h3 = h13[:, th:]
    gated = (h1 * jax.nn.sigmoid(h1)) * h3                 # SiLU gate in f32
    part = jnp.dot(gated.astype(w2_ref.dtype), w2_ref[...],
                   preferred_element_type=jnp.float32)

    # First step: write partial directly (no zero-fill).
    @pl.when(h_idx == 0)
    def _():
        acc_ref[...] = part

    # Middle steps: accumulate.
    @pl.when(jnp.logical_and(h_idx > 0, h_idx < n_h - 1))
    def _():
        acc_ref[...] += part

    # Last step: fuse final partial into the output store.
    @pl.when(h_idx == n_h - 1)
    def _():
        o_ref[...] = (acc_ref[...] + part).astype(o_ref.dtype)


# ----------------------------------------------------------------------------
# Wrapper
# ----------------------------------------------------------------------------
@functools.partial(jax.jit, static_argnames=("tm",))
def feed_forward_pallas(x, w13, w2c, *, tm=None):
    """x: (..., dim); w13/w2c from prepare_ffn_weights()."""
    orig_shape = x.shape
    dim = orig_shape[-1]
    n_h, dim_w, two_th = w13.shape
    th = two_th // 2
    assert dim_w == dim and w2c.shape == (n_h, th, dim)
    hidden = n_h * th

    compute_dtype = w13.dtype
    out_dtype = x.dtype

    # No wrapper-side pad / cast pass: reshape only, cast happens in-kernel.
    xm = x.reshape(-1, dim)
    M = xm.shape[0]

    tm_def, _, vmem_cap = _tpu_defaults()
    tm_eff = tm if tm is not None else tm_def
    # Shrink tile for decode-sized M (keep sublane dim a multiple of 8).
    tm_eff = max(8, min(tm_eff, _round_up(M, 8)))

    x_item = jnp.dtype(xm.dtype).itemsize
    w_item = jnp.dtype(compute_dtype).itemsize
    o_item = jnp.dtype(out_dtype).itemsize

    def _vmem_need(t):
        x_tile = t * dim * x_item
        w13_tile = dim * 2 * th * w_item
        w2_tile = th * dim * w_item
        o_tile = t * dim * o_item
        acc = t * dim * 4 if n_h > 1 else 0
        interm = t * 2 * th * 4 + t * th * 4          # f32 h13 + gated temps
        return 2 * (x_tile + w13_tile + w2_tile + o_tile) + acc + interm

    # Budget: ~85% of the chip's physical VMEM (64 MiB/TC on v7x, 128 MiB on
    # v5e/v6e) — never request more than the chip has.
    vmem_budget = int(0.85 * vmem_cap)
    while _vmem_need(tm_eff) > vmem_budget and tm_eff > 256:
        tm_eff = max(256, tm_eff // 2)
    vmem_limit = int(min(vmem_budget, max(int(1.3 * _vmem_need(tm_eff)), 32 << 20)))

    n_tok = pl.cdiv(M, tm_eff)

    weight_bytes = (w13.size + w2c.size) * w_item
    weight_reads = weight_bytes if n_h == 1 else weight_bytes * n_tok
    cost = pl.CostEstimate(
        flops=int(6 * M * dim * hidden),
        transcendentals=int(M * hidden),
        bytes_accessed=int(M * dim * x_item + weight_reads + M * dim * o_item),
    )

    if n_h == 1:
        # Fully resident weights: 1-D token grid, no accumulator.
        grid = (n_tok,)
        in_specs = [
            pl.BlockSpec((tm_eff, dim), lambda i: (i, 0)),
            pl.BlockSpec((None, dim, 2 * th), lambda i: (0, 0, 0)),
            pl.BlockSpec((None, th, dim), lambda i: (0, 0, 0)),
        ]
        out_spec = pl.BlockSpec((tm_eff, dim), lambda i: (i, 0))
        scratch = ()
        kernel = _ffn_kernel_fused
        dim_sem = ("parallel",)
    else:
        # Two-axis grid: token tiles (parallel) x hidden chunks (reduction, last).
        # TODO(synk): for v7x decode (n_tok == 1) split hidden chunks across the
        # two TensorCores and sum partials so the second core isn't idle.
        grid = (n_tok, n_h)
        in_specs = [
            pl.BlockSpec((tm_eff, dim), lambda i, h: (i, 0)),
            pl.BlockSpec((None, dim, 2 * th), lambda i, h: (h, 0, 0)),
            pl.BlockSpec((None, th, dim), lambda i, h: (h, 0, 0)),
        ]
        out_spec = pl.BlockSpec((tm_eff, dim), lambda i, h: (i, 0))
        scratch = (pltpu.VMEM((tm_eff, dim), jnp.float32),)
        kernel = _ffn_kernel_chunked
        dim_sem = ("parallel", "arbitrary")

    out = pl.pallas_call(
        kernel,
        out_shape=jax.ShapeDtypeStruct((M, dim), out_dtype),
        grid_spec=pltpu.PrefetchScalarGridSpec(
            num_scalar_prefetch=0,
            grid=grid,
            in_specs=in_specs,
            out_specs=out_spec,
            scratch_shapes=scratch,
        ),
        compiler_params=pltpu.CompilerParams(
            dimension_semantics=dim_sem,
            vmem_limit_bytes=vmem_limit,
        ),
        cost_estimate=cost,
    )(xm, w13, w2c)

    return out.reshape(orig_shape)


# ----------------------------------------------------------------------------
# Reference (same bf16-operand / f32-accumulate numerics as the kernel)
# ----------------------------------------------------------------------------
def feed_forward_ref(x, w1, w2, w3, compute_dtype=jnp.bfloat16):
    xc = x.astype(compute_dtype)
    h1 = jnp.dot(xc, w1.T.astype(compute_dtype), preferred_element_type=jnp.float32)
    h3 = jnp.dot(xc, w3.T.astype(compute_dtype), preferred_element_type=jnp.float32)
    gated = (h1 * jax.nn.sigmoid(h1)) * h3
    y = jnp.dot(gated.astype(compute_dtype), w2.T.astype(compute_dtype),
                preferred_element_type=jnp.float32)
    return y.astype(x.dtype)


if __name__ == "__main__":
    # Module config: dim=128, hidden_dim=4*dim=512, multiple_of=128
    # -> llama hidden_dim = 128 * ceil(int(2*512/3)/128) = 384
    dim = 128
    hidden = _llama_hidden_dim(dim, 4 * dim, multiple_of=128,
                               ffn_dim_multiplier=None)  # 384

    key = jax.random.PRNGKey(0)
    kx, k1, k2, k3, kx2 = jax.random.split(key, 5)
    # PyTorch nn.Linear layout (out_features, in_features).
    w1 = jax.random.normal(k1, (hidden, dim), dtype=jnp.float32) * 0.05
    w2 = jax.random.normal(k2, (dim, hidden), dtype=jnp.float32) * 0.05
    w3 = jax.random.normal(k3, (hidden, dim), dtype=jnp.float32) * 0.05

    # One-time weight prep (hoisted out of the forward pass).
    # Default: weights are tiny -> single-chunk fused path (resident weights).
    w13_s, w2c_s = prepare_ffn_weights(w1, w2, w3)
    # Forced chunking (th=128 -> 3 hidden chunks) to exercise the reduction /
    # accumulator path.
    w13_c, w2c_c = prepare_ffn_weights(w1, w2, w3, th=128,
                                       allow_single_chunk=False)

    def check(y, y_ref, name):
        assert y.shape == y_ref.shape, name
        assert jnp.allclose(y, y_ref, atol=2e-2, rtol=2e-2), \
            f"mismatch vs reference ({name})"

    # Case 1: batch=2, seq=8 (M=16) — single-chunk fused kernel.
    x = jax.random.normal(kx, (2, 8, dim), dtype=jnp.float32)
    y_ref = feed_forward_ref(x, w1, w2, w3)
    y = jax.block_until_ready(feed_forward_pallas(x, w13_s, w2c_s))
    check(y, y_ref, "single-chunk")

    # Case 2: ragged token count (M=10) — chunked kernel + ragged edge block.
    x2 = jax.random.normal(kx2, (2, 5, dim), dtype=jnp.float32)
    y2_ref = feed_forward_ref(x2, w1, w2, w3)
    y2 = jax.block_until_ready(feed_forward_pallas(x2, w13_c, w2c_c))
    check(y2, y2_ref, "chunked-ragged")

    # Case 3: multiple token tiles x multiple hidden chunks (tm=8 -> n_tok=2).
    y3 = jax.block_until_ready(feed_forward_pallas(x, w13_c, w2c_c, tm=8))
    check(y3, y_ref, "chunked-multitile")

    print("KERNEL_OK")
</pallas_src>

<mosaic_0001>
module attributes {stable_mosaic.version = 11 : i64} {
  func.func @_ffn_kernel_fused(%arg0: i32, %arg1: memref<16x128xf32, #tpu.memory_space<vmem>>, %arg2: memref<1x128x768xbf16, #tpu.memory_space<vmem>>, %arg3: memref<1x384x128xbf16, #tpu.memory_space<vmem>>, %arg4: memref<16x128xf32, #tpu.memory_space<vmem>>) attributes {dimension_semantics = [#tpu.dimension_semantics<parallel>], iteration_bounds = array<i64: 1>, scalar_prefetch = 0 : i64, scratch_operands = 0 : i64, tpu.core_type = #tpu.core_type<tc>, window_params = [{transform_indices = @transform_0, window_bounds = array<i64: 16, 128>}, {pipeline_mode = #tpu.pipeline_mode<synchronous>, transform_indices = @transform_1, window_bounds = array<i64: 1, 128, 768>}, {pipeline_mode = #tpu.pipeline_mode<synchronous>, transform_indices = @transform_2, window_bounds = array<i64: 1, 384, 128>}, {transform_indices = @transform_3, window_bounds = array<i64: 16, 128>}]} {
    %c0 = arith.constant 0 : index
    %c0_0 = arith.constant 0 : index
    %0 = vector.load %arg1[%c0, %c0_0] : memref<16x128xf32, #tpu.memory_space<vmem>>, vector<16x128xf32>
    %1 = arith.truncf %0 : vector<16x128xf32> to vector<16x128xbf16>
    %c0_1 = arith.constant 0 : index
    %c0_2 = arith.constant 0 : index
    %c0_3 = arith.constant 0 : index
    %2 = vector.load %arg2[%c0_1, %c0_2, %c0_3] : memref<1x128x768xbf16, #tpu.memory_space<vmem>>, vector<1x128x768xbf16>
    %3 = vector.shape_cast %2 : vector<1x128x768xbf16> to vector<128x768xbf16>
    %cst = arith.constant dense<0.000000e+00> : vector<16x768xf32>
    %4 = tpu.matmul %1, %3, %cst {dimension_numbers = #tpu.dot_dimension_numbers<[1], [0], [0], [1], [0, 0, 1, 1], [], []>} : vector<16x128xbf16>, vector<128x768xbf16>, vector<16x768xf32> -> vector<16x768xf32>
    %5 = vector.extract_strided_slice %4 {offsets = [0, 0], sizes = [16, 384], strides = [1, 1]} : vector<16x768xf32> to vector<16x384xf32>
    %6 = vector.extract_strided_slice %4 {offsets = [0, 384], sizes = [16, 384], strides = [1, 1]} : vector<16x768xf32> to vector<16x384xf32>
    %7 = arith.negf %5 : vector<16x384xf32>
    %8 = math.exp %7 : vector<16x384xf32>
    %cst_4 = arith.constant 1.000000e+00 : f32
    %9 = vector.broadcast %cst_4 : f32 to vector<16x384xf32>
    %10 = arith.addf %9, %8 : vector<16x384xf32>
    %11 = arith.divf %9, %10 : vector<16x384xf32>
    %12 = arith.mulf %5, %11 : vector<16x384xf32>
    %13 = arith.mulf %12, %6 : vector<16x384xf32>
    %14 = arith.truncf %13 : vector<16x384xf32> to vector<16x384xbf16>
    %c0_5 = arith.constant 0 : index
    %c0_6 = arith.constant 0 : index
    %c0_7 = arith.constant 0 : index
    %15 = vector.load %arg3[%c0_5, %c0_6, %c0_7] : memref<1x384x128xbf16, #tpu.memory_space<vmem>>, vector<1x384x128xbf16>
    %16 = vector.shape_cast %15 : vector<1x384x128xbf16> to vector<384x128xbf16>
    %cst_8 = arith.constant dense<0.000000e+00> : vector<16x128xf32>
    %17 = tpu.matmul %14, %16, %cst_8 {dimension_numbers = #tpu.dot_dimension_numbers<[1], [0], [0], [1], [0, 0, 1, 1], [], []>} : vector<16x384xbf16>, vector<384x128xbf16>, vector<16x128xf32> -> vector<16x128xf32>
    %c0_9 = arith.constant 0 : index
    %c0_10 = arith.constant 0 : index
    %18 = vector.load %arg4[%c0_9, %c0_10] : memref<16x128xf32, #tpu.memory_space<vmem>>, vector<16x128xf32>
    tpu.vector_store %arg4[%c0_9, %c0_10], %17 {strides = array<i32>} : memref<16x128xf32, #tpu.memory_space<vmem>>, vector<16x128xf32>,
    return
  }
  func.func @transform_0(%arg0: i32) -> (i32, i32) {
    %c0_i32 = arith.constant 0 : i32
    %c0_i32_0 = arith.constant 0 : i32
    return %arg0, %c0_i32 : i32, i32
  }
  func.func @transform_1(%arg0: i32) -> (i32, i32, i32) {
    %c0_i32 = arith.constant 0 : i32
    %c0_i32_0 = arith.constant 0 : i32
    %c0_i32_1 = arith.constant 0 : i32
    %c0_i32_2 = arith.constant 0 : i32
    return %c0_i32, %c0_i32_0, %c0_i32_1 : i32, i32, i32
  }
  func.func @transform_2(%arg0: i32) -> (i32, i32, i32) {
    %c0_i32 = arith.constant 0 : i32
    %c0_i32_0 = arith.constant 0 : i32
    %c0_i32_1 = arith.constant 0 : i32
    %c0_i32_2 = arith.constant 0 : i32
    return %c0_i32, %c0_i32_0, %c0_i32_1 : i32, i32, i32
  }
  func.func @transform_3(%arg0: i32) -> (i32, i32) {
    %c0_i32 = arith.constant 0 : i32
    %c0_i32_0 = arith.constant 0 : i32
    return %arg0, %c0_i32 : i32, i32
  }
}

</mosaic_0001>

<bundles_post_ra>
// kernel: feed_forward_pallas.1
= control target key start
LH: loop header
LB: loop body
LE: loop exit
PB: predicated region body
PF: predicated region fallthrough
CT: control target
= control target key end

     0   :  { %8 = vsyncpa [#allocation3], 0  ;;  %s1268_s0 = inlined_call_operand.hbm [shape: f32[16,128], index: 0, kind: input, shape index: {}]   ;;  %s1269_s1 = inlined_call_operand.hbm [shape: bf16[1,128,768], index: 1, kind: input, shape index: {}]   ;;  %s1270_s2 = inlined_call_operand.hbm [shape: bf16[1,384,128], index: 2, kind: input, shape index: {}]   ;;  %s1271_s3 = inlined_call_operand.hbm [shape: f32[16,128], index: 3, kind: output, shape index: {}]  }
   0x1   :  { %9 = vsyncpa [#allocation6], 0 }
   0x2   :  { %10 = vsyncpa [#allocation4], 0  ;;  %s1178_s12 = smov [#allocation5]   ;;  %s1084_s16 = scalar_lea.hbm %s1269_s1, 6144 }
   0x3   :  { %s28_s13 = sshll.u32 %s1178_s12, 4  ;;  %p1085_p0 = scmp.ne.s32.totalorder %s1269_s1, %s1084_s16  ;;  %s29_s13 = int_to_ptr.vmem [resolvable:$true] %s28_s13 }
   0x4   :  { %p1088_p1 = scmp.lt.u32.totalorder %s1084_s16, %s1269_s1 }
   0x6   :  { %p1090_p2 = pnand %p1088_p1, %p1085_p0 }
   0x8   :  { %1093 = shalt.err (!%p1090_p2)
}
   0x9   :  { %s1094_s21 = scalar_lea.vmem %s29_s13, 6144  ;;  %p1099_p4 = scmp.lt.s32.totalorder %s29_s13, %s29_s13 }
   0xa   :  { %p1095_p3 = scmp.ne.s32.totalorder %s29_s13, %s1094_s21  ;;  %p1100_p5 = scmp.lt.s32.totalorder %s1094_s21, %s1094_s21 }
   0xc   :  { %p1101_p6 = por %p1100_p5, %p1099_p4 }
   0xe   :  { %p1102_p7 = pnand %p1101_p6, %p1095_p3 }
  0x10   :  { %1105 = shalt.err (!%p1102_p7)
}
  0x11   :  { %s1179_s22 = smov 384   ;;  %s1180_s23 = smov 24  }
  0x12   :  { %34 = dma.hbm_to_vmem [thread:$0]  %s1269_s1, 6144, %s29_s13, [#allocation6], %s1179_s22, %s1179_s22, %s1180_s23  }
  0x13   :  { %s1181_s26 = smov [#allocation2]   ;;  %s1106_s30 = scalar_lea.hbm %s1268_s0, 256 }
  0x14   :  { %s16_s27 = sshll.u32 %s1181_s26, 4  ;;  %p1107_p8 = scmp.ne.s32.totalorder %s1268_s0, %s1106_s30  ;;  %s17_s27 = int_to_ptr.vmem [resolvable:$true] %s16_s27 }
  0x15   :  { %p1110_p9 = scmp.lt.u32.totalorder %s1106_s30, %s1268_s0 }
  0x17   :  { %p1112_p10 = pnand %p1110_p9, %p1107_p8 }
  0x19   :  { %1115 = shalt.err (!%p1112_p10)
}
  0x1a   :  { %s1116_s8 = scalar_lea.vmem %s17_s27, 256  ;;  %p1121_p12 = scmp.lt.s32.totalorder %s17_s27, %s17_s27 }
  0x1b   :  { %p1117_p11 = scmp.ne.s32.totalorder %s17_s27, %s1116_s8  ;;  %p1122_p13 = scmp.lt.s32.totalorder %s1116_s8, %s1116_s8 }
  0x1d   :  { %p1123_p0 = por %p1122_p13, %p1121_p12 }
  0x1f   :  { %p1124_p1 = pnand %p1123_p0, %p1117_p11 }
  0x21   :  { %1127 = shalt.err (!%p1124_p1)
}
  0x22   :  { %s1182_s1 = smov 128   ;;  %s1183_s9 = smov 8  }
  0x23   :  { %22 = dma.hbm_to_vmem [thread:$0]  %s1268_s0, 256, %s17_s27, [#allocation3], %s1182_s1, %s1182_s1, %s1183_s9  }
  0x24   :  { %s1184_s12 = smov [#allocation7]   ;;  %s1128_s16 = scalar_lea.hbm %s1270_s2, 3072 }
  0x25   :  { %s40_s13 = sshll.u32 %s1184_s12, 4  ;;  %p1129_p2 = scmp.ne.s32.totalorder %s1270_s2, %s1128_s16  ;;  %s41_s13 = int_to_ptr.vmem [resolvable:$true] %s40_s13 }
  0x26   :  { %p1132_p3 = scmp.lt.u32.totalorder %s1128_s16, %s1270_s2 }
  0x28   :  { %p1134_p4 = pnand %p1132_p3, %p1129_p2 }
  0x2a   :  { %1137 = shalt.err (!%p1134_p4)
}
  0x2b   :  { %s1138_s21 = scalar_lea.vmem %s41_s13, 3072  ;;  %p1143_p6 = scmp.lt.s32.totalorder %s41_s13, %s41_s13 }
  0x2c   :  { %p1139_p5 = scmp.ne.s32.totalorder %s41_s13, %s1138_s21  ;;  %p1144_p7 = scmp.lt.s32.totalorder %s1138_s21, %s1138_s21 }
  0x2e   :  { %p1145_p8 = por %p1144_p7, %p1143_p6 }
  0x30   :  { %p1146_p9 = pnand %p1145_p8, %p1139_p5 }
  0x32   :  { %1149 = shalt.err (!%p1146_p9)
}
  0x33   :  { %s1185_s0 = smov 64   ;;  %s1186_s22 = smov 4  }
  0x34   :  { %46 = dma.hbm_to_vmem [thread:$0]  %s1270_s2, 3072, %s41_s13, [#allocation6], %s1185_s0, %s1185_s0, %s1186_s22  }
  0x35   :  { %1172 = dma.done.wait [#allocation3], 256  }
  0x36   :  { %1173 = vsyncadd [#allocation3], 4294967040 }
  0x37   :  { %1174 = dma.done.wait [#allocation6], 9216  }
  0x38   :  { %1175 = vsyncadd [#allocation6], 4294958080  ;;  %v1187_v0 = vmov 0   ;;  %v964_v1 = vld [vmem:[#allocation5 + $0x4] ss:$24 sps:$4 sm:$0xff]   ;;  %v57_v33 = vld [vmem:[#allocation2] sm:$0xff] }
  0x39   :  { %380 = vmatprep.mubr.bf16.mxu0 %v1187_v0  ;;  %423 = vmatprep.mubr.bf16.mxu1 %v1187_v0  ;;  %v966_v2 = vld [vmem:[#allocation5 + $0xc] ss:$24 sps:$4 sm:$0xff]   ;;  %v968_v3 = vld [vmem:[#allocation5] ss:$24 sps:$4 sm:$0xff]   ;;  %v972_v6 = vld [vmem:[#allocation5 + $0x3c] ss:$24 sps:$4 sm:$0xff]  }
  0x3a   :  { %348 = vmatprep.subr.bf16.mxu0 %v964_v1  ;;  %v969_v4 = vld [vmem:[#allocation5 + $0x8] ss:$24 sps:$4 sm:$0xff]   ;;  %391 = vmatprep.subr.bf16.mxu1 %v966_v2  ;;  %v970_v5 = vld [vmem:[#allocation5 + $0x34] ss:$24 sps:$4 sm:$0xff]   ;;  %v975_v8 = vld [vmem:[#allocation5 + $0x38] ss:$24 sps:$4 sm:$0xff]  }
  0x3b   :  { %349 = vmatpush1.bf16.msra.mxu0 %v968_v3  ;;  %392 = vmatpush1.bf16.msra.mxu1 %v969_v4  ;;  %v974_v7 = vld [vmem:[#allocation5 + $0x30] ss:$24 sps:$4 sm:$0xff]   ;;  %v976_v9 = vld [vmem:[#allocation5 + $0x64] ss:$24 sps:$4 sm:$0xff]   ;;  %v980_v11 = vld [vmem:[#allocation5 + $0x60] ss:$24 sps:$4 sm:$0xff]  }
  0x3c   :  { %350 = vmatprep.subr.bf16.mxu0 %v970_v5  ;;  %393 = vmatprep.subr.bf16.mxu1 %v972_v6  ;;  %v978_v10 = vld [vmem:[#allocation5 + $0x6c] ss:$24 sps:$4 sm:$0xff]   ;;  %v981_v12 = vld [vmem:[#allocation5 + $0x68] ss:$24 sps:$4 sm:$0xff]   ;;  %v984_v14 = vld [vmem:[#allocation5 + $0x9c] ss:$24 sps:$4 sm:$0xff]  }
  0x3d   :  { %v982_v13 = vld [vmem:[#allocation5 + $0x94] ss:$24 sps:$4 sm:$0xff]   ;;  %v986_v15 = vld [vmem:[#allocation5 + $0x90] ss:$24 sps:$4 sm:$0xff]   ;;  %v988_v17 = vld [vmem:[#allocation5 + $0xc4] ss:$24 sps:$4 sm:$0xff]  }
  0x3e   :  { %v987_v16 = vld [vmem:[#allocation5 + $0x98] ss:$24 sps:$4 sm:$0xff]   ;;  %v990_v18 = vld [vmem:[#allocation5 + $0xcc] ss:$24 sps:$4 sm:$0xff]   ;;  %v993_v20 = vld [vmem:[#allocation5 + $0xc8] ss:$24 sps:$4 sm:$0xff]  }
  0x3f   :  { %351 = vmatpush1.bf16.msra.mxu0 %v974_v7  ;;  %394 = vmatpush1.bf16.msra.mxu1 %v975_v8  ;;  %v992_v19 = vld [vmem:[#allocation5 + $0xc0] ss:$24 sps:$4 sm:$0xff]   ;;  %v994_v21 = vld [vmem:[#allocation5 + $0xf4] ss:$24 sps:$4 sm:$0xff]   ;;  %v998_v23 = vld [vmem:[#allocation5 + $0xf0] ss:$24 sps:$4 sm:$0xff]  }
  0x40   :  { %352 = vmatprep.subr.bf16.mxu0 %v976_v9  ;;  %395 = vmatprep.subr.bf16.mxu1 %v978_v10  ;;  %v996_v22 = vld [vmem:[#allocation5 + $0xfc] ss:$24 sps:$4 sm:$0xff]   ;;  %v999_v24 = vld [vmem:[#allocation5 + $0xf8] ss:$24 sps:$4 sm:$0xff]   ;;  %v1002_v26 = vld [vmem:[#allocation5 + $0x12c] ss:$24 sps:$4 sm:$0xff]  }
  0x41   :  { %v1000_v25 = vld [vmem:[#allocation5 + $0x124] ss:$24 sps:$4 sm:$0xff]   ;;  %v1004_v27 = vld [vmem:[#allocation5 + $0x120] ss:$24 sps:$4 sm:$0xff]   ;;  %v1006_v29 = vld [vmem:[#allocation5 + $0x154] ss:$24 sps:$4 sm:$0xff]  }
  0x42   :  { %v1005_v28 = vld [vmem:[#allocation5 + $0x128] ss:$24 sps:$4 sm:$0xff]   ;;  %v1008_v30 = vld [vmem:[#allocation5 + $0x15c] ss:$24 sps:$4 sm:$0xff]   ;;  %v1011_v32 = vld [vmem:[#allocation5 + $0x158] ss:$24 sps:$4 sm:$0xff]  }
  0x43   :  { %353 = vmatpush1.bf16.msra.mxu0 %v980_v11  ;;  %396 = vmatpush1.bf16.msra.mxu1 %v981_v12  ;;  %v1010_v31 = vld [vmem:[#allocation5 + $0x150] ss:$24 sps:$4 sm:$0xff]   ;;  %v58_v34 = vld [vmem:[#allocation2 + $0x8] sm:$0xff]  ;;  %v1014_v35 = vld [vmem:[#allocation5 + $0x14] ss:$24 sps:$4 sm:$0xff]   ;;  %v1188_v55 = vmov 0.0  }
  0x44   :  { %354 = vmatprep.subr.bf16.mxu0 %v982_v13  ;;  %397 = vmatprep.subr.bf16.mxu1 %v984_v14  ;;  %v59_v36 = vpack.c.bf16 %v58_v34, %v57_v33  ;;  %v1012_v37 = vld [vmem:[#allocation5 + $0x10] ss:$24 sps:$4 sm:$0xff]   ;;  %v1017_v38 = vld [vmem:[#allocation5 + $0x44] ss:$24 sps:$4 sm:$0xff]   ;;  %v1015_v39 = vld [vmem:[#allocation5 + $0x40] ss:$24 sps:$4 sm:$0xff]  }
  0x45   :  { %v1020_v40 = vld [vmem:[#allocation5 + $0x74] ss:$24 sps:$4 sm:$0xff]   ;;  %v1018_v41 = vld [vmem:[#allocation5 + $0x70] ss:$24 sps:$4 sm:$0xff]   ;;  %v1023_v42 = vld [vmem:[#allocation5 + $0xa4] ss:$24 sps:$4 sm:$0xff]  }
  0x46   :  { %v1021_v43 = vld [vmem:[#allocation5 + $0xa0] ss:$24 sps:$4 sm:$0xff]   ;;  %v1026_v44 = vld [vmem:[#allocation5 + $0xd4] ss:$24 sps:$4 sm:$0xff]   ;;  %v1024_v45 = vld [vmem:[#allocation5 + $0xd0] ss:$24 sps:$4 sm:$0xff]  }
  0x47   :  { %355 = vmatpush1.bf16.msra.mxu0 %v986_v15  ;;  %398 = vmatpush1.bf16.msra.mxu1 %v987_v16  ;;  %v1029_v46 = vld [vmem:[#allocation5 + $0x104] ss:$24 sps:$4 sm:$0xff]   ;;  %v1027_v47 = vld [vmem:[#allocation5 + $0x100] ss:$24 sps:$4 sm:$0xff]   ;;  %v1032_v48 = vld [vmem:[#allocation5 + $0x134] ss:$24 sps:$4 sm:$0xff]  }
  0x48   :  { %356 = vmatprep.subr.bf16.mxu0 %v988_v17  ;;  %399 = vmatprep.subr.bf16.mxu1 %v990_v18  ;;  %v1030_v49 = vld [vmem:[#allocation5 + $0x130] ss:$24 sps:$4 sm:$0xff]   ;;  %v1035_v50 = vld [vmem:[#allocation5 + $0x164] ss:$24 sps:$4 sm:$0xff]   ;;  %v1033_v51 = vld [vmem:[#allocation5 + $0x160] ss:$24 sps:$4 sm:$0xff]  }
  0x49   :  { %v1036_v52 = vld [vmem:[#allocation7 + $0x40] sm:$0xff]   ;;  %v1039_v56 = vld [vmem:[#allocation7 + $0x48] sm:$0xff]   ;;  %v1042_v59 = vld [vmem:[#allocation7 + $0x50] sm:$0xff]   ;;  %vm1189_vm0 = vmmov 0   ;;  %s1190_s2 = smov [#allocation8]  }
  0x4a   :  { %v1037_v53 = vld [vmem:[#allocation7] sm:$0xff]   ;;  %v1040_v57 = vld [vmem:[#allocation7 + $0x8] sm:$0xff]   ;;  %v1043_v60 = vld [vmem:[#allocation7 + $0x10] sm:$0xff]   ;;  %s809_s25 = sshll.u32 %s1190_s2, 4  ;;  %s810_s25 = int_to_ptr.vmem [resolvable:$true] %s809_s25 }
  0x4b   :  { %357 = vmatpush1.bf16.msra.mxu0 %v992_v19  ;;  %400 = vmatpush1.bf16.msra.mxu1 %v993_v20  ;;  %v1038_v54 = vld [vmem:[#allocation7 + $0x80] sm:$0xff]   ;;  %v1041_v58 = vld [vmem:[#allocation7 + $0x88] sm:$0xff]   ;;  %v1044_v61 = vld [vmem:[#allocation7 + $0x90] sm:$0xff]   ;;  %s1150_s26 = scalar_lea.vmem %s810_s25, 256  ;;  %p1155_p11 = scmp.lt.s32.totalorder %s810_s25, %s810_s25 }
  0x4c   :  { %358 = vmatprep.subr.bf16.mxu0 %v994_v21  ;;  %401 = vmatprep.subr.bf16.mxu1 %v996_v22  ;;  %v1045_v62 = vld [vmem:[#allocation7 + $0x58] sm:$0xff]   ;;  %v1048_v1 = vld [vmem:[#allocation7 + $0x60] sm:$0xff]   ;;  %v1051_v4 = vld [vmem:[#allocation7 + $0x68] sm:$0xff]   ;;  %p1151_p10 = scmp.ne.s32.totalorder %s810_s25, %s1150_s26  ;;  %p1156_p12 = scmp.lt.s32.totalorder %s1150_s26, %s1150_s26 }
  0x4d   :  { %v1046_v63 = vld [vmem:[#allocation7 + $0x18] sm:$0xff]   ;;  %v1049_v2 = vld [vmem:[#allocation7 + $0x20] sm:$0xff]   ;;  %v1052_v5 = vld [vmem:[#allocation7 + $0x28] sm:$0xff]  }
  0x4e   :  { %v1050_v3 = vld [vmem:[#allocation7 + $0xa0] sm:$0xff]   ;;  %v1053_v6 = vld [vmem:[#allocation7 + $0xa8] sm:$0xff]   ;;  %v1054_v7 = vld [vmem:[#allocation7 + $0x70] sm:$0xff]   ;;  %p1157_p13 = por %p1156_p12, %p1155_p11 }
  0x4f   :  { %359 = vmatpush1.bf16.msra.mxu0 %v998_v23  ;;  %402 = vmatpush1.bf16.msra.mxu1 %v999_v24  ;;  %v1055_v8 = vld [vmem:[#allocation7 + $0x30] sm:$0xff]   ;;  %v1057_v10 = vld [vmem:[#allocation7 + $0x78] sm:$0xff]  }
  0x50   :  { %360 = vmatprep.subr.bf16.mxu0 %v1000_v25  ;;  %403 = vmatprep.subr.bf16.mxu1 %v1002_v26  ;;  %v1056_v9 = vld [vmem:[#allocation7 + $0xb0] sm:$0xff]   ;;  %v1058_v11 = vld [vmem:[#allocation7 + $0x38] sm:$0xff]   ;;  %p1158_p0 = pnand %p1157_p13, %p1151_p10 }
  0x51   :  { %v1059_v12 = vld [vmem:[#allocation7 + $0xb8] sm:$0xff]  }
  0x53   :  { %361 = vmatpush1.bf16.msra.mxu0 %v1004_v27  ;;  %404 = vmatpush1.bf16.msra.mxu1 %v1005_v28 }
  0x54   :  { %362 = vmatprep.subr.bf16.mxu0 %v1006_v29  ;;  %405 = vmatprep.subr.bf16.mxu1 %v1008_v30 }
  0x57   :  { %363 = vmatpush1.bf16.msra.mxu0 %v1010_v31  ;;  %406 = vmatpush1.bf16.msra.mxu1 %v1011_v32 }
  0x58   :  { %434 = vmatprep.subr.bf16.mxu0 %v1014_v35  ;;  %900 = vmatprep.subr.bf16.mxu1 %v1036_v52 }
  0x5a   :  { %381 = vmatmul.mubr.bf16.vlgmr.msra.gmra.mrb[0].mxu0 %v59_v36  ;;  %424 = vmatmul.mubr.bf16.vlgmr.msra.gmra.mrb[0].mxu1 %v59_v36 }
  0x5b   :  { %435 = vmatpush1.bf16.msra.mxu0 %v1012_v37  ;;  %466 = vmatprep.mubr.bf16.mxu0 %v1187_v0  ;;  %v1047_v0 = vld [vmem:[#allocation7 + $0x98] sm:$0xff]  }
  0x5c   :  { %436 = vmatprep.subr.bf16.mxu0 %v1017_v38  ;;  %901 = vmatpush3.bf16.msra.mxu1 %v1037_v53 }
  0x5d   :  { %902 = vmatprep.subr.bf16.mxu1 %v1039_v56 }
  0x5f   :  { %437 = vmatpush1.bf16.msra.mxu0 %v1015_v39 }
  0x60   :  { %438 = vmatprep.subr.bf16.mxu0 %v1020_v40  ;;  %903 = vmatpush3.bf16.msra.mxu1 %v1040_v57 }
  0x61   :  { %904 = vmatprep.subr.bf16.mxu1 %v1042_v59 }
  0x63   :  { %439 = vmatpush1.bf16.msra.mxu0 %v1018_v41 }
  0x64   :  { %440 = vmatprep.subr.bf16.mxu0 %v1023_v42  ;;  %905 = vmatpush3.bf16.msra.mxu1 %v1043_v60 }
  0x65   :  { %906 = vmatprep.subr.bf16.mxu1 %v1045_v62 }
  0x67   :  { %441 = vmatpush1.bf16.msra.mxu0 %v1021_v43 }
  0x68   :  { %442 = vmatprep.subr.bf16.mxu0 %v1026_v44  ;;  %907 = vmatpush3.bf16.msra.mxu1 %v1046_v63 }
  0x69   :  { %908 = vmatprep.subr.bf16.mxu1 %v1048_v1 }
  0x6b   :  { %443 = vmatpush1.bf16.msra.mxu0 %v1024_v45 }
  0x6c   :  { %444 = vmatprep.subr.bf16.mxu0 %v1029_v46  ;;  %909 = vmatpush3.bf16.msra.mxu1 %v1049_v2 }
  0x6d   :  { %910 = vmatprep.subr.bf16.mxu1 %v1051_v4 }
  0x6f   :  { %445 = vmatpush1.bf16.msra.mxu0 %v1027_v47 }
  0x70   :  { %446 = vmatprep.subr.bf16.mxu0 %v1032_v48  ;;  %911 = vmatpush3.bf16.msra.mxu1 %v1052_v5 }
  0x71   :  { %912 = vmatprep.subr.bf16.mxu1 %v1054_v7 }
  0x73   :  { %447 = vmatpush1.bf16.msra.mxu0 %v1030_v49 }
  0x74   :  { %448 = vmatprep.subr.bf16.mxu0 %v1035_v50  ;;  %913 = vmatpush3.bf16.msra.mxu1 %v1055_v8 }
  0x75   :  { %914 = vmatprep.subr.bf16.mxu1 %v1057_v10 }
  0x77   :  { %449 = vmatpush1.bf16.msra.mxu0 %v1033_v51 }
  0x78   :  { %931 = vmatprep.subr.bf16.mxu0 %v1188_v55  ;;  %915 = vmatpush3.bf16.msra.mxu1 %v1058_v11 }
  0x7a   :  { %467 = vmatmul.mubr.bf16.vlgmr.msra.gmra.mrb[4].mxu0 %v59_v36 }
  0x7b   :  { %932 = vmatpush3.bf16.msra.mxu0 %v1038_v54  ;;  %947 = vmatprep.mubr.msk.bf16.mxu0 %vm1189_vm0, %v1188_v55 }
  0x7c   :  { %933 = vmatprep.subr.bf16.mxu0 %v1188_v55 }
  0x7f   :  { %934 = vmatpush3.bf16.msra.mxu0 %v1041_v58 }
  0x80   :  { %935 = vmatprep.subr.bf16.mxu0 %v1188_v55 }
  0x83   :  { %936 = vmatpush3.bf16.msra.mxu0 %v1044_v61 }
  0x84   :  { %937 = vmatprep.subr.bf16.mxu0 %v1188_v55 }
  0x87   :  { %938 = vmatpush3.bf16.msra.mxu0 %v1047_v0 }
  0x88   :  { %939 = vmatprep.subr.bf16.mxu0 %v1188_v55 }
  0x8b   :  { %940 = vmatpush3.bf16.msra.mxu0 %v1050_v3 }
  0x8c   :  { %941 = vmatprep.subr.bf16.mxu0 %v1188_v55 }
  0x8f   :  { %942 = vmatpush3.bf16.msra.mxu0 %v1053_v6 }
  0x90   :  { %943 = vmatprep.subr.bf16.mxu0 %v1188_v55 }
  0x93   :  { %944 = vmatpush3.bf16.msra.mxu0 %v1056_v9 }
  0x94   :  { %945 = vmatprep.subr.bf16.mxu0 %v1188_v55 }
  0x97   :  { %946 = vmatpush3.bf16.msra.mxu0 %v1059_v12 }
 0x12d   :  { %v382_v13 = vpop.f32.mrb[0].mxu0  ;;  %v425_v14 = vpop.f32.mrb[0].mxu1 }
 0x12e   :  { %v870_v15 = vmul.f32 -1.442695, %v382_v13  ;;  %v872_v16 = vmul.f32 -1.442695, %v425_v14  ;;  %v384_v17 = vpop.f32.mrb[1].mxu0  ;;  %v427_v18 = vpop.f32.mrb[1].mxu1 }
 0x12f   :  { %v871_v19 = vmul.f32 -1.442695, %v384_v17  ;;  %v386_v20 = vpop.f32.mrb[2].mxu0  ;;  %v429_v21 = vpop.f32.mrb[2].mxu1 }
 0x130   :  { %1060 = vpow2.f32 %v870_v15  ;;  %v873_v22 = vmul.f32 -1.442695, %v386_v20  ;;  %v875_v23 = vmul.f32 -1.442695, %v429_v21  ;;  %v388_v24 = vpop.f32.mrb[3].mxu0  ;;  %v431_v25 = vpop.f32.mrb[3].mxu1 }
 0x131   :  { %1062 = vpow2.f32 %v872_v16  ;;  %v874_v26 = vmul.f32 -1.442695, %v388_v24 }
 0x132   :  { %1064 = vpow2.f32 %v871_v19 }
 0x133   :  { %1066 = vpow2.f32 %v873_v22 }
 0x134   :  { %1068 = vpow2.f32 %v875_v23 }
 0x135   :  { %1070 = vpow2.f32 %v874_v26 }
 0x13a   :  { %v1061_v27 = vpop.eup %1060 }
 0x13b   :  { %v1063_v28 = vpop.eup %1062  ;;  %v495_v29 = vadd.f32 1.0, %v1061_v27 }
 0x13c   :  { %v1065_v30 = vpop.eup %1064  ;;  %v497_v31 = vadd.f32 1.0, %v1063_v28 }
 0x13d   :  { %v1067_v32 = vpop.eup %1066  ;;  %1072 = vrcp.f32 %v495_v29  ;;  %v496_v33 = vadd.f32 1.0, %v1065_v30 }
 0x13e   :  { %v1069_v34 = vpop.eup %1068  ;;  %1074 = vrcp.f32 %v497_v31  ;;  %v498_v35 = vadd.f32 1.0, %v1067_v32 }
 0x13f   :  { %v1071_v36 = vpop.eup %1070  ;;  %1076 = vrcp.f32 %v496_v33  ;;  %v500_v37 = vadd.f32 1.0, %v1069_v34 }
 0x140   :  { %1078 = vrcp.f32 %v498_v35  ;;  %v499_v38 = vadd.f32 1.0, %v1071_v36 }
 0x141   :  { %1080 = vrcp.f32 %v500_v37 }
 0x142   :  { %1082 = vrcp.f32 %v499_v38 }
 0x147   :  { %v1073_v39 = vpop.eup %1072 }
 0x148   :  { %v1075_v40 = vpop.eup %1074  ;;  %v513_v41 = vmul.f32 %v1073_v39, %v382_v13 }
 0x149   :  { %v1077_v42 = vpop.eup %1076  ;;  %v515_v49 = vmul.f32 %v1075_v40, %v425_v14 }
 0x14a   :  { %v1079_v43 = vpop.eup %1078  ;;  %v519_v44 = vmul.f32 %v513_v41, %v427_v18  ;;  %v514_v48 = vmul.f32 %v1077_v42, %v384_v17 }
 0x14b   :  { %v1081_v45 = vpop.eup %1080  ;;  %v516_v46 = vmul.f32 %v1079_v43, %v386_v20 }
 0x14c   :  { %v1083_v47 = vpop.eup %1082  ;;  %v518_v55 = vmul.f32 %v1081_v45, %v429_v21 }
 0x14d   :  { %v522_v50 = vmul.f32 %v516_v46, %v431_v25  ;;  %v468_v51 = vpop.f32.mrb[4].mxu0  ;;  %v517_v52 = vmul.f32 %v1083_v47, %v388_v24 }
 0x14e   :  { %v520_v53 = vmul.f32 %v514_v48, %v468_v51  ;;  %v470_v54 = vpop.f32.mrb[5].mxu0 }
 0x14f   :  { %v525_v56 = vpack.c.bf16 %v522_v50, %v519_v44  ;;  %v521_v57 = vmul.f32 %v515_v49, %v470_v54  ;;  %v472_v58 = vpop.f32.mrb[6].mxu0 }
 0x150   :  { %v523_v59 = vmul.f32 %v517_v52, %v472_v58  ;;  %v474_v60 = vpop.f32.mrb[7].mxu0 }
 0x151   :  { %v524_v61 = vmul.f32 %v518_v55, %v474_v60 }
 0x152   :  { %v526_v62 = vpack.c.bf16 %v523_v59, %v520_v53 }
 0x153   :  { %v527_v63 = vpack.c.bf16 %v524_v61, %v521_v57 }
 0x154   :  { %752 = vmatprep.mubr.bf16.mxu1 %v526_v62 }
 0x155   :  { %753 = vmatmul.mubr.bf16.vlgmr.msra.gmra.mrb[4].mxu1 %v525_v56  ;;  %948 = vmatmul.mubr.bf16.vlgmr.msra.gmra.mrb[8].mxu0 %v527_v63 }
 0x228   :  { %v916_v0 = vpop.f32.mrb[4].mxu1  ;;  %v795_v1 = vpop.f32.mrb[8].mxu0 }
 0x229   :  { %v917_v2 = vpop.f32.mrb[5].mxu1  ;;  %v949_v3 = vpop.f32.mrb[9].mxu0 }
 0x22a   :  { %v918_v4 = vadd.f32 %v917_v2, %v916_v0  ;;  %v919_v5 = vpop.f32.mrb[6].mxu1  ;;  %v798_v6 = vpop.f32.mrb[10].mxu0 }
 0x22b   :  { %v920_v7 = vpop.f32.mrb[7].mxu1  ;;  %v950_v8 = vpop.f32.mrb[11].mxu0 }
 0x22c   :  { %v796_v9 = vadd.f32 %v918_v4, %v795_v1  ;;  %v921_v10 = vadd.f32 %v920_v7, %v919_v5 }
 0x22e   :  { %802 = vst [vmem:[#allocation8] sm:$0xff] %v796_v9  ;;  %v799_v11 = vadd.f32 %v921_v10, %v798_v6 }
 0x230   :  { %803 = vst [vmem:[#allocation8 + $0x8] sm:$0xff] %v799_v11 }
 0x231   :  { %1161 = shalt.err (!%p1158_p0)
}
 0x232   :  { %s1162_s29 = scalar_lea.hbm %s1271_s3, 256 }
 0x233   :  { %p1163_p1 = scmp.ne.s32.totalorder %s1271_s3, %s1162_s29  ;;  %p1166_p2 = scmp.lt.u32.totalorder %s1162_s29, %s1271_s3 }
 0x235   :  { %p1168_p3 = pnand %p1166_p2, %p1163_p1 }
 0x237   :  { %1171 = shalt.err (!%p1168_p3)
}
 0x238   :  { %815 = dma.vmem_to_hbm [thread:$0]  %s810_s25, 256, %s1271_s3, [#allocation4], %s1182_s1, %s1182_s1, %s1183_s9  }
 0x239   :  { %1176 = dma.done.wait [#allocation4], 256  }
 0x23a   :  { %1177 = vsyncadd [#allocation4], 4294967040 }
 0x23b   :  { %819 = vsyncpa [#allocation3], 1 }
 0x23c   :  { %820 = vsyncpa [#allocation6], 1 }
 0x23d   :  { %821 = vsyncpa [#allocation4], 1 }

</bundles_post_ra>
